<compile_context>
chip_gen: v6e
topology: v6e:2x2x1
jax: 0.10.0
libtpu: 0.0.40
codegen_flags: <defaults>
</compile_context>

<pallas_src>
import functools

import jax
import jax.numpy as jnp
from jax.experimental import pallas as pl
from jax.experimental.pallas import tpu as pltpu


def _ls_ce_kernel(preds_ref, target_ref, out_ref, *, num_rows: int, tile_rows: int):
    i = pl.program_id(0)

    x = preds_ref[...].astype(jnp.float32)          # [TB, C]  (f32 compute)
    t = target_ref[...]                             # [TB, 1]  int32
    tb, c = x.shape

    # Mask for rows that fall past the true batch size (last, padded tile).
    row = jax.lax.broadcasted_iota(jnp.int32, (tb, 1), 0) + i * tile_rows
    valid = row < num_rows                          # [TB, 1] bool
    # Keep padded rows finite so the max/exp path can't produce inf/nan.
    x = jnp.where(valid, x, 0.0)

    # Numerically stable log-softmax pieces.
    m = jnp.max(x, axis=-1, keepdims=True)                          # [TB, 1]
    shifted = x - m                                                 # [TB, C]
    lse = jnp.log(jnp.sum(jnp.exp(shifted), axis=-1, keepdims=True))  # [TB, 1]

    # Smoothing term per row: -sum_c log_softmax = C*lse - sum_c shifted
    neg_sum_logp = jnp.float32(c) * lse - jnp.sum(shifted, axis=-1, keepdims=True)

    # NLL term per row: -(shifted[t] - lse) = lse - shifted[t]
    # Fused gather: select target column from `shifted` directly (no one-hot mul).
    cols = jax.lax.broadcasted_iota(jnp.int32, (tb, c), 1)          # [TB, C]
    picked = jnp.sum(jnp.where(cols == t, shifted, 0.0), axis=-1, keepdims=True)
    neg_logp_t = lse - picked                                       # [TB, 1]

    loss_sum = jnp.sum(jnp.where(valid, neg_sum_logp, 0.0))         # scalar
    nll_sum = jnp.sum(jnp.where(valid, neg_logp_t, 0.0))            # scalar

    # Write partial sums into this tile's (1, 8, 128) output block:
    # lane 0 -> loss_sum, lane 1 -> nll_sum, everything else 0.
    lane = jax.lax.broadcasted_iota(jnp.int32, (1, 8, 128), 2)
    out_ref[...] = jnp.where(lane == 0, loss_sum,
                             jnp.where(lane == 1, nll_sum, 0.0))


def _choose_tile_batch(B: int, C: int, itemsize: int,
                       target_bytes: int = 4 * 1024 * 1024) -> int:
    """Pick a batch tile so one input buffer stays ~<= 4 MiB (safe on v5e/v6e/v7x)."""
    rows = max(8, target_bytes // max(1, C * itemsize))
    if rows >= B:
        return B                       # full batch fits: block dim == array dim
    return max(8, (rows // 8) * 8)     # otherwise keep it a multiple of 8


def label_smoothing_cross_entropy(preds: jax.Array, target: jax.Array,
                                  epsilon: float = 0.1,
                                  tile_batch: int | None = None) -> jax.Array:
    """preds: [B, C] float (any float dtype); target: [B] int. Scalar f32 loss."""
    B, C = preds.shape
    target2d = target.reshape(B, 1).astype(jnp.int32)

    tb = tile_batch if tile_batch is not None else _choose_tile_batch(
        B, C, jnp.dtype(preds.dtype).itemsize)
    num_tiles = (B + tb - 1) // tb

    # TODO(synk): for vocab-scale C (>= ~64k) also tile the class axis with an
    # online logsumexp (2-D grid, reduction axis last); single-axis tiling here.
    partial = pl.pallas_call(
        functools.partial(_ls_ce_kernel, num_rows=B, tile_rows=tb),
        out_shape=jax.ShapeDtypeStruct((num_tiles, 8, 128), jnp.float32),
        grid=(num_tiles,),
        in_specs=[
            pl.BlockSpec((tb, C), lambda i: (i, 0)),
            pl.BlockSpec((tb, 1), lambda i: (i, 0)),
        ],
        out_specs=pl.BlockSpec((1, 8, 128), lambda i: (i, 0, 0)),
        compiler_params=pltpu.CompilerParams(
            dimension_semantics=("parallel",),
            vmem_limit_bytes=32 * 1024 * 1024),
    )(preds, target2d)

    loss_sum = jnp.sum(partial[:, 0, 0])
    nll_sum = jnp.sum(partial[:, 0, 1])
    loss = loss_sum / jnp.float32(B)     # reduction='mean'
    nll = nll_sum / jnp.float32(B)
    eps = jnp.float32(epsilon)
    return eps * (loss / jnp.float32(C)) + (jnp.float32(1.0) - eps) * nll


def _reference(preds, target, epsilon=0.1):
    """Pure-JAX reference mirroring the PyTorch module (cls_weights=None, mean)."""
    preds = preds.astype(jnp.float32)
    n = preds.shape[-1]
    log_preds = jax.nn.log_softmax(preds, axis=-1)
    loss = jnp.mean(-jnp.sum(log_preds, axis=-1))
    nll = jnp.mean(-jnp.take_along_axis(log_preds, target[:, None], axis=-1)[:, 0])
    return epsilon * (loss / n) + (1.0 - epsilon) * nll


if __name__ == "__main__":
    key = jax.random.PRNGKey(0)
    k1, k2 = jax.random.split(key)

    # Small shapes; tile_batch=8 with B=12 exercises multi-tile + padded-row masking.
    B, C = 12, 128
    preds = jax.random.normal(k1, (B, C), dtype=jnp.float32)
    target = jax.random.randint(k2, (B,), 0, C, dtype=jnp.int32)

    out = label_smoothing_cross_entropy(preds, target, epsilon=0.1, tile_batch=8)
    out = jax.block_until_ready(out)

    ref = _reference(preds, target, epsilon=0.1)
    assert jnp.allclose(out, ref, atol=1e-5, rtol=1e-5), (out, ref)

    print("KERNEL_OK")
</pallas_src>

<mosaic_0001>
module attributes {stable_mosaic.version = 11 : i64} {
  func.func @_ls_ce_kernel(%arg0: i32, %arg1: memref<8x128xf32, #tpu.memory_space<vmem>>, %arg2: memref<8x1xi32, #tpu.memory_space<vmem>>, %arg3: memref<1x8x128xf32, #tpu.memory_space<vmem>>) attributes {dimension_semantics = [#tpu.dimension_semantics<parallel>], iteration_bounds = array<i64: 2>, scalar_prefetch = 0 : i64, scratch_operands = 0 : i64, tpu.core_type = #tpu.core_type<tc>, window_params = [{transform_indices = @transform_0, window_bounds = array<i64: 8, 128>}, {transform_indices = @transform_1, window_bounds = array<i64: 8, 1>}, {transform_indices = @transform_2, window_bounds = array<i64: 1, 8, 128>}]} {
    %c0 = arith.constant 0 : index
    %c0_0 = arith.constant 0 : index
    %0 = vector.load %arg1[%c0, %c0_0] : memref<8x128xf32, #tpu.memory_space<vmem>>, vector<8x128xf32>
    %c0_1 = arith.constant 0 : index
    %c0_2 = arith.constant 0 : index
    %1 = vector.load %arg2[%c0_1, %c0_2] : memref<8x1xi32, #tpu.memory_space<vmem>>, vector<8x1xi32>
    %2 = tpu.iota {dimensions = array<i32: 0>} : vector<8x1xi32>
    %c8_i32 = arith.constant 8 : i32
    %3 = arith.muli %arg0, %c8_i32 : i32
    %4 = vector.broadcast %3 : i32 to vector<8x1xi32>
    %5 = arith.addi %2, %4 : vector<8x1xi32>
    %c12_i32 = arith.constant 12 : i32
    %6 = vector.broadcast %c12_i32 : i32 to vector<8x1xi32>
    %7 = arith.cmpi slt, %5, %6 : vector<8x1xi32>
    %cst = arith.constant 0.000000e+00 : f32
    %8 = vector.shape_cast %7 : vector<8x1xi1> to vector<8x1xi1>
    %9 = vector.broadcast %8 : vector<8x1xi1> to vector<8x128xi1>
    %10 = vector.broadcast %cst : f32 to vector<8x128xf32>
    %11 = arith.select %9, %0, %10 : vector<8x128xi1>, vector<8x128xf32>
    %cst_3 = arith.constant dense<0xFF800000> : vector<8xf32>
    %12 = vector.multi_reduction <maximumf>, %11, %cst_3 [1] : vector<8x128xf32> to vector<8xf32>
    %13 = vector.shape_cast %12 : vector<8xf32> to vector<8x1xf32>
    %14 = vector.broadcast %13 : vector<8x1xf32> to vector<8x128xf32>
    %15 = arith.subf %11, %14 : vector<8x128xf32>
    %16 = math.exp %15 : vector<8x128xf32>
    %cst_4 = arith.constant dense<0.000000e+00> : vector<8xf32>
    %17 = vector.multi_reduction <add>, %16, %cst_4 [1] : vector<8x128xf32> to vector<8xf32>
    %18 = vector.shape_cast %17 : vector<8xf32> to vector<8x1xf32>
    %19 = math.log %18 : vector<8x1xf32>
    %cst_5 = arith.constant 1.280000e+02 : f32
    %20 = vector.broadcast %cst_5 : f32 to vector<8x1xf32>
    %21 = arith.mulf %20, %19 : vector<8x1xf32>
    %cst_6 = arith.constant dense<0.000000e+00> : vector<8xf32>
    %22 = vector.multi_reduction <add>, %15, %cst_6 [1] : vector<8x128xf32> to vector<8xf32>
    %23 = vector.shape_cast %22 : vector<8xf32> to vector<8x1xf32>
    %24 = arith.subf %21, %23 : vector<8x1xf32>
    %25 = tpu.iota {dimensions = array<i32: 1>} : vector<8x128xi32>
    %26 = vector.broadcast %1 : vector<8x1xi32> to vector<8x128xi32>
    %27 = arith.cmpi eq, %25, %26 : vector<8x128xi32>
    %cst_7 = arith.constant 0.000000e+00 : f32
    %28 = vector.broadcast %cst_7 : f32 to vector<8x128xf32>
    %29 = arith.select %27, %15, %28 : vector<8x128xi1>, vector<8x128xf32>
    %cst_8 = arith.constant dense<0.000000e+00> : vector<8xf32>
    %30 = vector.multi_reduction <add>, %29, %cst_8 [1] : vector<8x128xf32> to vector<8xf32>
    %31 = vector.shape_cast %30 : vector<8xf32> to vector<8x1xf32>
    %32 = arith.subf %19, %31 : vector<8x1xf32>
    %cst_9 = arith.constant 0.000000e+00 : f32
    %33 = vector.broadcast %cst_9 : f32 to vector<8x1xf32>
    %34 = arith.select %7, %24, %33 : vector<8x1xi1>, vector<8x1xf32>
    %35 = vector.shape_cast %34 : vector<8x1xf32> to vector<1x8x1xf32>
    %cst_10 = arith.constant dense<0.000000e+00> : vector<1xf32>
    %36 = vector.multi_reduction <add>, %35, %cst_10 [1, 2] : vector<1x8x1xf32> to vector<1xf32>
    %37 = vector.shape_cast %36 : vector<1xf32> to vector<1x1x1xf32>
    %38 = vector.extract %37[0, 0, 0] : f32 from vector<1x1x1xf32>
    %cst_11 = arith.constant 0.000000e+00 : f32
    %39 = vector.broadcast %cst_11 : f32 to vector<8x1xf32>
    %40 = arith.select %7, %32, %39 : vector<8x1xi1>, vector<8x1xf32>
    %41 = vector.shape_cast %40 : vector<8x1xf32> to vector<1x8x1xf32>
    %cst_12 = arith.constant dense<0.000000e+00> : vector<1xf32>
    %42 = vector.multi_reduction <add>, %41, %cst_12 [1, 2] : vector<1x8x1xf32> to vector<1xf32>
    %43 = vector.shape_cast %42 : vector<1xf32> to vector<1x1x1xf32>
    %44 = vector.extract %43[0, 0, 0] : f32 from vector<1x1x1xf32>
    %45 = tpu.iota {dimensions = array<i32: 2>} : vector<1x8x128xi32>
    %c0_i32 = arith.constant 0 : i32
    %46 = vector.broadcast %c0_i32 : i32 to vector<1x8x128xi32>
    %47 = arith.cmpi eq, %45, %46 : vector<1x8x128xi32>
    %c1_i32 = arith.constant 1 : i32
    %48 = vector.broadcast %c1_i32 : i32 to vector<1x8x128xi32>
    %49 = arith.cmpi eq, %45, %48 : vector<1x8x128xi32>
    %cst_13 = arith.constant 0.000000e+00 : f32
    %50 = vector.broadcast %44 : f32 to vector<1x8x128xf32>
    %51 = vector.broadcast %cst_13 : f32 to vector<1x8x128xf32>
    %52 = arith.select %49, %50, %51 : vector<1x8x128xi1>, vector<1x8x128xf32>
    %53 = vector.broadcast %38 : f32 to vector<1x8x128xf32>
    %54 = arith.select %47, %53, %52 : vector<1x8x128xi1>, vector<1x8x128xf32>
    %c0_14 = arith.constant 0 : index
    %c0_15 = arith.constant 0 : index
    %c0_16 = arith.constant 0 : index
    %55 = vector.load %arg3[%c0_14, %c0_15, %c0_16] : memref<1x8x128xf32, #tpu.memory_space<vmem>>, vector<1x8x128xf32>
    tpu.vector_store %arg3[%c0_14, %c0_15, %c0_16], %54 {strides = array<i32>} : memref<1x8x128xf32, #tpu.memory_space<vmem>>, vector<1x8x128xf32>,
    return
  }
  func.func @transform_0(%arg0: i32) -> (i32, i32) {
    %c0_i32 = arith.constant 0 : i32
    %c0_i32_0 = arith.constant 0 : i32
    return %arg0, %c0_i32 : i32, i32
  }
  func.func @transform_1(%arg0: i32) -> (i32, i32) {
    %c0_i32 = arith.constant 0 : i32
    %c0_i32_0 = arith.constant 0 : i32
    return %arg0, %c0_i32 : i32, i32
  }
  func.func @transform_2(%arg0: i32) -> (i32, i32, i32) {
    %c0_i32 = arith.constant 0 : i32
    %c0_i32_0 = arith.constant 0 : i32
    %c0_i32_1 = arith.constant 0 : i32
    return %arg0, %c0_i32, %c0_i32_0 : i32, i32, i32
  }
}

</mosaic_0001>

<bundles_post_ra>
// kernel: tpu_custom_call.1
= control target key start
LH: loop header
LB: loop body
LE: loop exit
PB: predicated region body
PF: predicated region fallthrough
CT: control target
= control target key end

     0   :  { %7 = vsyncpa [#allocation3], 0  ;;  %s545_s0 = inlined_call_operand.vmem [shape: f32[12,128], index: 0, kind: input, shape index: {}]   ;;  %s546_s1 = inlined_call_operand.vmem [shape: s32[12,1], index: 1, kind: input, shape index: {}]   ;;  %s547_s2 = inlined_call_operand.hbm [shape: f32[2,8,128], index: 2, kind: output, shape index: {}]  }
   0x1   :  { %9 = vsyncpa [#allocation3 + $0x1], 0  ;;  %s445_s9 = smov 0   ;;  %s447_s10 = smov 0  }
   0x2   :  { %s449_s11 = smov 0   ;;  %s451_s12 = smov 0  }
   0x3 LB: > { %s466_s13 = sadd.s32 4294967295, %s426_s12   ;;  %s305_s14 = sadd.s32 4294967294, %s426_s12   ;;  %s426_s12 = sphi %s451_s12, %s553_s12   ;;  %s422_s11 = sphi %s449_s11, %s552_s11   ;;  %s418_s10 = sphi %s447_s10, %s551_s10   ;;  %s414_s9 = sphi %s445_s9, %s550_s9  }
   0x4   : > { %s470_s15 = sadd.s32 1, %s426_s12   ;;  %s74_s16 = sadd.s32 1, %s422_s11 }
   0x5   : > { %s71_s17 = ssub.s32 %s426_s12, %s470_s15  ;;  %p84_p0 = scmp.ne.s32.totalorder %s422_s11, %s418_s10 }
   0x6   : > { %p72_p1 = scmp.eq.s32.totalorder %s71_s17, 0  ;;  %p85_p2 = scmp.eq.s32.totalorder %s466_s13, 1 }
   0x7   : > { %p90_p3 = scmp.ne.s32.totalorder %s418_s10, %s414_s9  ;;  %p91_p4 = scmp.eq.s32.totalorder %s305_s14, 1 }
   0x8   : > { %s481_s18 = scalar_select %p72_p1, %s422_s11, %s74_s16  }
   0x9   : > { %p483_p5 = por %p85_p2, %p84_p0  ;;  %p487_p6 = por %p91_p4, %p90_p3 }
   0xa   : > { %p308_p7 = scmp.ge.s32.totalorder %s426_s12, 1  ;;  %p123_p8 = scmp.lt.s32.totalorder %s426_s12, 3 }
   0xc   : > { %p124_p9 = pnand %p308_p7, %p123_p8 }
   0xd   : > { %p148_p10 = scmp.lt.s32.totalorder (!%p124_p9), %s466_s13, 1  ;;  %s312_s21 = sshll.u32 (!%p124_p9), %s466_s13, 3 }
   0xe   : > { %127 = sbr.rel (%p124_p9) target bundleno = 563 (0x233), region = 28  ;;  %s145_s30 = sand.u32 (!%p124_p9), 1, %s418_s10  }
   0xf   : > { %s309_s3 = sshll.u32 (!%p124_p9), %s145_s30, 3  ;;  %s314_s4 = sshll.u32 (!%p124_p9), %s466_s13, 7 }
  0x10   : > { %s147_s6 = scalar_lea.vmem (!%p124_p9), [#allocation2], %s309_s3  ;;  %s510_s17 = scalar_lea.hbm (!%p124_p9), %s547_s2, %s314_s4 }
  0x11   : > { %s234_s7 = sshll.u32 (!%p124_p9), %s147_s6, 4  ;;  %s235_s7 = int_to_ptr.vmem [resolvable:$true] %s234_s7 }
  0x13   : > { %v158_v0 = vlaneseq  ;;  %v161_v1 = vstv %s312_s21  ;;  %v428_v2 = vmov 0   ;;  %s149_s22 = scalar_select %p148_p10, %s466_s13, 1  ;;  %vm191_vm2 = vcmask 7168  }
  0x14   : > { %361 = vset.pattern.permute.xlu0 %v428_v2  ;;  %s221_s21 = scalar_lea.sflag [#allocation3], %s145_s30  ;;  %s366_s13 = scalar_lea.vmem %s235_s7, 128 }
  0x15   : > { %v159_v3 = vshrl.u32 %v158_v0, 7  ;;  %s310_s23 = sshll.u32 %s149_s22, 3  ;;  %v181_v12 = vand.u32 127, %v158_v0  ;;  %p367_p11 = scmp.ne.s32.totalorder %s235_s7, %s366_s13 }
  0x16   : > { %s151_s26 = scalar_lea.vmem %s545_s0, %s310_s23  ;;  %s155_s29 = scalar_lea.vmem %s546_s1, %s310_s23 }
  0x17   : > { %v162_v4 = vadd.s32 %v161_v1, %v159_v3  ;;  %v156_v5 = vld [vmem:[%s151_s26] sm:$0xff]  ;;  %vm214_vm3 = vcmp.eq.s32.totalorder %v181_v12, 1  ;;  %vm213_vm4 = vcmp.eq.s32.totalorder %v181_v12, 0  ;;  %p368_p12 = pnand %p367_p11, %p483_p5  ;;  %s429_s22 = smov [#allocation2]  }
  0x18   : > { %v157_v7 = vld [vmem:[%s155_s29] sm:$0xff]  ;;  %s370_s23 = sshll.u32 %s429_s22, 4  ;;  %s371_s23 = int_to_ptr.vmem [resolvable:$false] %s370_s23 }
  0x19   : > { %vm163_vm0 = vcmp.lt.s32.totalorder %v162_v4, 12  ;;  %p369_p13 = pneg %p368_p12  ;;  %s372_s24 = scalar_lea.vmem %s371_s23, 256 }
  0x1a   : > { %v166_v6 = vsel %vm163_vm0, %v156_v5, 0.0  ;;  %p373_p0 = scmp.lt.s32.totalorder %s235_s7, %s371_s23  ;;  %p374_p1 = scmp.lt.s32.totalorder %s372_s24, %s366_s13 }
  0x1b   : > { %167 = vmax.xlane.f32.xlu0 %v166_v6 }
  0x1c   : > { %p375_p2 = por %p374_p1, %p373_p0 }
  0x1e   : > { %p376_p3 = pnand %p375_p2, %p369_p13 }
  0x31   : > { %183 = vperm.xlu0 %361, %v157_v7  }
  0xa4   : > { %v168_v8 = vpop.xlane.xlu0 %167 }
  0xa5   : > { %v169_v9 = vsub.f32 %v166_v6, %v168_v8 }
  0xa7   : > { %v170_v10 = vmul.f32 1.442695, %v169_v9 }
  0xa9   : > { %362 = vpow2.f32 %v170_v10 }
  0xac   : > { %v184_v13 = vpop.permute.xlu0 %183 }
  0xad   : > { %vm185_vm1 = vcmp.eq.s32.totalorder %v181_v12, %v184_v13 }
  0xae   : > { %v186_v14 = vsel %vm185_vm1, %v169_v9, 0.0 }
  0xb6   : > { %v363_v11 = vpop.eup %362 }
  0xb7   : > { %172 = vadd.xlane.f32.xlu1 %v363_v11 }
  0xbb   : > { %177 = vadd.xlane.f32.xlu1 %v169_v9 }
  0xbf   : > { %187 = vadd.xlane.f32.xlu1 %v186_v14 }
 0x140   : > { %v173_v15 = vpop.xlane.xlu1 %172 }
 0x141   : > { %364 = vlog2.f32 %v173_v15 }
 0x144   : > { %v178_v16 = vpop.xlane.xlu1 %177 }
 0x148   : > { %v188_v20 = vpop.xlane.xlu1 %187 }
 0x14e   : > { %v365_v17 = vpop.eup %364 }
 0x14f   : > { %v175_v18 = vmul.f32 0.6931472, %v365_v17 }
 0x151   : > { %v176_v19 = vmul.f32 128.0, %v175_v18  ;;  %v189_v22 = vsub.f32 %v175_v18, %v188_v20 }
 0x153   : > { %v179_v21 = vsub.f32 %v176_v19, %v178_v16  ;;  %v202_v25 = vsel %vm163_vm0, %v189_v22, 0.0 }
 0x154   : > { %v203_v26 = vsel %vm191_vm2, %v202_v25, 0.0 }
 0x155   : > { %v190_v23 = vsel %vm163_vm0, %v179_v21, 0.0 }
 0x156   : > { %v192_v24 = vsel %vm191_vm2, %v190_v23, 0.0 }
 0x157   : > { %193 = vadd.xlane.f32.xlu1 %v192_v24 }
 0x15b   : > { %204 = vadd.xlane.f32.xlu1 %v203_v26 }
 0x1e0   : > { %v194_v27 = vpop.xlane.xlu1 %193 }
 0x1e1   : > { %v195_v28 = vrot.slane %v194_v27, 4 }
 0x1e3   : > { %v196_v29 = vadd.f32 %v195_v28, %v194_v27 }
 0x1e4   : > { %v205_v30 = vpop.xlane.xlu1 %204 }
 0x1e5   : > { %v197_v31 = vrot.slane %v196_v29, 2  ;;  %v206_v32 = vrot.slane %v205_v30, 4 }
 0x1e7   : > { %v207_v33 = vadd.f32 %v206_v32, %v205_v30  ;;  %v198_v34 = vadd.f32 %v197_v31, %v196_v29 }
 0x1e9   : > { %v208_v35 = vrot.slane %v207_v33, 2  ;;  %v199_v36 = vrot.slane %v198_v34, 1 }
 0x1eb   : > { %v209_v37 = vadd.f32 %v208_v35, %v207_v33  ;;  %v200_v38 = vadd.f32 %v199_v36, %v198_v34 }
 0x1ed   : > { %317 = vpush %v200_v38  ;;  %v210_v39 = vrot.slane %v209_v37, 1 }
 0x1ef   : > { %v211_v40 = vadd.f32 %v210_v39, %v209_v37 }
 0x1f1   : > { %319 = vpush %v211_v40 }
 0x21e   : > { %s318_s5 = spop %317 }
 0x21f   : > { %v217_v42 = vstv %s318_s5 }
 0x222   : > { %s320_s8 = spop %319 }
 0x223   : > { %v215_v41 = vstv %s320_s8 }
 0x224   : > { %v216_v43 = vsel %vm214_vm3, %v215_v41, 0.0 }
 0x225   : > { %v218_v44 = vsel %vm213_vm4, %v217_v42, %v216_v43 }
 0x226   : > { %219 = vst [vmem:[%s147_s6] sm:$0xff] %v218_v44 }
 0x227   : > { %379 = shalt.err (!%p376_p3)
}
 0x228   : > { %s380_s25 = scalar_lea.hbm %s510_s17, 128  ;;  %s384_s28 = scalar_lea.hbm %s547_s2, 256 }
 0x229   : > { %p381_p4 = scmp.ne.s32.totalorder %s510_s17, %s380_s25  ;;  %p385_p9 = scmp.lt.s32.totalorder %s510_s17, %s547_s2 }
 0x22a   : > { %p386_p10 = scmp.lt.s32.totalorder %s384_s28, %s380_s25 }
 0x22b   : > { %p382_p7 = pnand %p381_p4, %p483_p5 }
 0x22c   : > { %p387_p11 = por %p386_p10, %p385_p9 }
 0x22d   : > { %p383_p8 = pneg %p382_p7 }
 0x22f   : > { %p388_p12 = pnand %p387_p11, %p383_p8 }
 0x231   : > { %391 = shalt.err (!%p388_p12)
}
 0x232   : > { %321 = dma.vmem_to_hbm [thread:$0]  (%p483_p5), %s235_s7, 128, %s510_s17, %s221_s21  }
 0x233 PF: > { %p327_p13 = scmp.ge.s32.totalorder %s426_s12, 2  ;;  %s246_s3 = sand.u32 1, %s414_s9  }
 0x234   : > { %s247_s4 = scalar_lea.sflag [#allocation3], %s246_s3 }
 0x235   : > { %p324_p0 = pnand %p327_p13, %p487_p6 }
 0x237   : > { %p325_p1 = pneg %p324_p0 }
 0x239   : > { %409 = dma.done.wait (%p325_p1), %s247_s4, 128  }
 0x23a   : > { %411 = vsyncadd (%p325_p1), %s247_s4, 4294967168  ;;  %p12_p2 = scmp.ge.s32.totalorder %s470_s15, 4   ;;  %s550_s9 = smov %s418_s10 }
 0x23b   : > { %s551_s10 = smov %s422_s11  ;;  %s552_s11 = smov %s481_s18 }
 0x23c   : > { %s553_s12 = smov %s470_s15  ;;  %14 = sbr.rel (!%p12_p2) target bundleno = 3 (0x3), region = 66 }
 0x241   :  { %252 = vsyncpa [#allocation3], 1 }
 0x242   :  { %254 = vsyncpa [#allocation3 + $0x1], 1 }

</bundles_post_ra>
